<compile_context>
chip_gen: v7x
topology: tpu7x:2x2x1
jax: 0.10.0
libtpu: 0.0.40
codegen_flags: <defaults>
</compile_context>

<pallas_src>
import functools

import jax
import jax.numpy as jnp
from jax import lax
from jax.experimental import pallas as pl
from jax.experimental.pallas import tpu as pltpu

C_PAD = 128  # class axis padded to one full vreg lane width (lane-dense output)


def _round_up(x, m):
    return ((x + m - 1) // m) * m


def _choose_tiles(n):
    """Pick S row/contraction tile sizes: large (>=1-2 MiB bf16 S per step),
    generation-aware, and divisors of the padded node count."""
    try:
        kind = jax.devices()[0].device_kind.lower()
    except Exception:  # pragma: no cover - defensive
        kind = ""
    is_v5e = ("v5 lite" in kind) or ("v5e" in kind) or ("v5lite" in kind)
    tm_target = 256 if is_v5e else 512
    tk_target = 1024 if is_v5e else 2048

    n_pad = _round_up(max(n, 1), 128)
    m = n_pad // 128

    def pick(target):
        best = 1
        for d in range(1, m + 1):
            if m % d == 0 and d * 128 <= target:
                best = d
        return best * 128

    return n_pad, pick(tm_target), pick(tk_target)


def _vmem_limit_bytes(tm, tk):
    """Explicit, generation-aware scoped-VMEM limit (v5e default is only 16 MiB)."""
    est = (
        2 * tm * tk * 2          # S tiles, bf16, double-buffered
        + 2 * tk * C_PAD * 2     # H contraction tiles, bf16, double-buffered
        + 2 * tm * C_PAD * 4     # output tiles (f32 worst case), double-buffered
        + tm * C_PAD * 4         # f32 row-tile accumulator scratch
        + 2 * C_PAD * 4          # bias
    )
    try:
        cap = int(pltpu.get_tpu_info().vmem_capacity_bytes)
    except Exception:  # pragma: no cover - defensive
        cap = 64 << 20  # assume the smallest (v7x) physical VMEM
    # >=1.5x estimate for Mosaic internal scratch, floor 20 MiB, cap at ~75% of
    # physical VMEM (v7x has only 64 MiB per TensorCore).
    return int(min(max(int(est * 1.5), 20 << 20), int(cap * 0.75)))


def sgc_hop_kernel(s_ref, h_ref, b_ref, o_ref, acc_ref, *, num_classes, is_last):
    """One grid step of one propagation hop: (row tile i, contraction tile kk).

    s_ref:  (tm, tk)   bf16 tile of the normalized adjacency S
    h_ref:  (tk, 128)  bf16 tile of the carried activation H (= S^h X W)
    o_ref:  (tm, 128)  bf16 next H (intermediate hop) or f32 log-probs (last hop)
    acc_ref:(tm, 128)  f32 per-row-tile accumulator scratch
    """
    kk = pl.program_id(1)
    n_k = pl.num_programs(1)

    # Native bf16 x bf16 MXU matmul with f32 accumulation.
    part = jnp.dot(s_ref[...], h_ref[...], preferred_element_type=jnp.float32)

    @pl.when(kk == 0)
    def _():
        acc_ref[...] = part          # overwrite: no zero-fill needed

    @pl.when(kk > 0)
    def _():
        acc_ref[...] += part

    @pl.when(kk == n_k - 1)
    def _():
        if is_last:
            # Bias + masked log_softmax over the real classes, lane-dense store.
            logits = acc_ref[...] + b_ref[...]
            lane = lax.broadcasted_iota(jnp.int32, logits.shape, 1)
            logits = jnp.where(lane < num_classes, logits, -1e30)
            m = jnp.max(logits, axis=-1, keepdims=True)
            z = logits - m
            lse = jnp.log(jnp.sum(jnp.exp(z), axis=-1, keepdims=True))
            o_ref[...] = (z - lse).astype(o_ref.dtype)
        else:
            # Carry the next H as bf16 (accumulation itself stayed f32).
            o_ref[...] = acc_ref[...].astype(o_ref.dtype)


def sgc_forward(s, x, w, b, *, k):
    """Pallas forward: log_softmax(S^K (X W) + b), S streamed bf16 from HBM."""
    if k < 1:
        raise ValueError("SGCNet kernel requires K >= 1 propagation hops.")
    n, f = x.shape
    c = w.shape[1]
    n_pad, tm, tk = _choose_tiles(n)

    # Zero-padding is inert: padded rows/cols of S are zero, padded classes of
    # W/b are zero, and padded outputs are sliced off below.
    s_p = jnp.zeros((n_pad, n_pad), jnp.float32).at[:n, :n].set(s).astype(jnp.bfloat16)
    h0 = jnp.dot(x, w)  # tiny [N, F] x [F, C] matmul -> plain XLA
    h = (jnp.zeros((n_pad, C_PAD), jnp.float32).at[:n, :c].set(h0)
         .astype(jnp.bfloat16))
    b_p = jnp.zeros((1, C_PAD), jnp.float32).at[0, :c].set(b)

    grid = (n_pad // tm, n_pad // tk)
    vmem_limit = _vmem_limit_bytes(tm, tk)

    for hop in range(k):
        is_last = hop == k - 1
        out_dtype = jnp.float32 if is_last else jnp.bfloat16
        h = pl.pallas_call(
            functools.partial(sgc_hop_kernel, num_classes=c, is_last=is_last),
            out_shape=jax.ShapeDtypeStruct((n_pad, C_PAD), out_dtype),
            grid_spec=pltpu.PrefetchScalarGridSpec(
                num_scalar_prefetch=0,
                grid=grid,
                in_specs=[
                    # S tiles streamed bf16 from HBM every step.
                    pl.BlockSpec((tm, tk), lambda i, kk: (i, kk)),
                    # Carried activation, streamed along the contraction axis.
                    pl.BlockSpec((tk, C_PAD), lambda i, kk: (kk, 0)),
                    # Bias: tiny, resident (constant block index).
                    pl.BlockSpec((1, C_PAD), lambda i, kk: (0, 0)),
                ],
                # Constant block index across kk -> output flushed once per row tile.
                out_specs=pl.BlockSpec((tm, C_PAD), lambda i, kk: (i, 0)),
                scratch_shapes=[pltpu.VMEM((tm, C_PAD), jnp.float32)],
            ),
            compiler_params=pltpu.CompilerParams(
                # Row tiles are independent within a hop -> "parallel" lets v7x's
                # two TensorCores each stream their own rows of S.
                dimension_semantics=("parallel", "arbitrary"),
                vmem_limit_bytes=vmem_limit,
            ),
        )(s_p, h, b_p)
    return h[:n, :c]


def build_normalized_adjacency(edge_index, num_nodes):
    """Dense S = D^{-1/2} (A + I) D^{-1/2} matching PyG gcn_norm semantics.

    edge_index is [2, E]; message passing sends x[row] -> node col, so the
    dense propagation matrix has S[col, row] = norm.  (Assumes edge_index has
    no pre-existing self-loops, like PyG's add_remaining_self_loops.)
    """
    row, col = edge_index[0], edge_index[1]
    a = jnp.zeros((num_nodes, num_nodes), dtype=jnp.float32)
    a = a.at[col, row].add(1.0)                      # A_hat[target, source]
    a = a + jnp.eye(num_nodes, dtype=jnp.float32)    # add self-loops
    deg = jnp.sum(a, axis=1)
    dinv = jnp.where(deg > 0, 1.0 / jnp.sqrt(deg), 0.0)
    return dinv[:, None] * a * dinv[None, :]


def reference_forward(s, x, w, b, k):
    # Mirrors the module's math (propagate, linear, log_softmax) with the same
    # bf16 rounding points the kernel uses (bf16 S, bf16-carried intermediate H,
    # f32 accumulation, final hop kept f32).
    s_bf = s.astype(jnp.bfloat16).astype(jnp.float32)
    h = (x @ w).astype(jnp.bfloat16).astype(jnp.float32)
    for hop in range(k):
        h = s_bf @ h
        if hop != k - 1:
            h = h.astype(jnp.bfloat16).astype(jnp.float32)
    logits = h + b[None, :]
    return jax.nn.log_softmax(logits, axis=1)


if __name__ == "__main__":
    # Small synthetic graph consistent with SGConv(in=num_features, out=num_classes, K=k).
    num_nodes = 300
    num_features = 48
    num_classes = 7
    num_edges = 1500
    k_hops = 2

    key = jax.random.PRNGKey(0)
    kx, ke1, ke2, kw, kb = jax.random.split(key, 5)

    # Node features (PyG: data.x), float32 on TPU.
    x = jax.random.normal(kx, (num_nodes, num_features), dtype=jnp.float32)

    # Random directed edge_index [2, E] (no self-loops; gcn_norm adds them).
    src = jax.random.randint(ke1, (num_edges,), 0, num_nodes)
    dst = jax.random.randint(ke2, (num_edges,), 0, num_nodes)
    dst = jnp.where(dst == src, (dst + 1) % num_nodes, dst)
    edge_index = jnp.stack([src, dst], axis=0)

    # Linear-layer parameters: weight [F, C] (== PyG weight.T), bias [C].
    w = jax.random.normal(kw, (num_features, num_classes), dtype=jnp.float32) * 0.1
    b = jax.random.normal(kb, (num_classes,), dtype=jnp.float32) * 0.1

    # Glue: dense normalized adjacency built in plain JAX.
    s = build_normalized_adjacency(edge_index, num_nodes)

    out = sgc_forward(s, x, w, b, k=k_hops)
    out = jax.block_until_ready(out)

    ref = reference_forward(s, x, w, b, k_hops)

    assert out.shape == (num_nodes, num_classes)
    max_err = float(jnp.max(jnp.abs(out - ref)))
    # bf16-carried H / bf16 S: a few x 1e-3 parity vs the (f32) reference;
    # the PyTorch module is f64, which TPU Pallas cannot match (see TODO above).
    assert jnp.allclose(out, ref, atol=1e-2, rtol=1e-2), max_err

    print("KERNEL_OK")
</pallas_src>

<mosaic_0001>
module attributes {stable_mosaic.version = 11 : i64} {
  func.func @sgc_hop_kernel(%arg0: i32, %arg1: i32, %arg2: memref<384x384xbf16, #tpu.memory_space<vmem>>, %arg3: memref<384x128xbf16, #tpu.memory_space<vmem>>, %arg4: memref<1x128xf32, #tpu.memory_space<vmem>>, %arg5: memref<384x128xbf16, #tpu.memory_space<vmem>>, %arg6: memref<384x128xf32, #tpu.memory_space<vmem>>) attributes {dimension_semantics = [#tpu.dimension_semantics<parallel>, #tpu.dimension_semantics<arbitrary>], iteration_bounds = array<i64: 1, 1>, scalar_prefetch = 0 : i64, scratch_operands = 1 : i64, tpu.core_type = #tpu.core_type<tc>, window_params = [{transform_indices = @transform_0, window_bounds = array<i64: 384, 384>}, {transform_indices = @transform_1, window_bounds = array<i64: 384, 128>}, {pipeline_mode = #tpu.pipeline_mode<synchronous>, transform_indices = @transform_2, window_bounds = array<i64: 1, 128>}, {transform_indices = @transform_3, window_bounds = array<i64: 384, 128>}]} {
    %c0 = arith.constant 0 : index
    %c0_0 = arith.constant 0 : index
    %0 = vector.load %arg2[%c0, %c0_0] : memref<384x384xbf16, #tpu.memory_space<vmem>>, vector<384x384xbf16>
    %c0_1 = arith.constant 0 : index
    %c0_2 = arith.constant 0 : index
    %1 = vector.load %arg3[%c0_1, %c0_2] : memref<384x128xbf16, #tpu.memory_space<vmem>>, vector<384x128xbf16>
    %cst = arith.constant dense<0.000000e+00> : vector<384x128xf32>
    %2 = tpu.matmul %0, %1, %cst {dimension_numbers = #tpu.dot_dimension_numbers<[1], [0], [0], [1], [0, 0, 1, 1], [], []>} : vector<384x384xbf16>, vector<384x128xbf16>, vector<384x128xf32> -> vector<384x128xf32>
    %c0_i32 = arith.constant 0 : i32
    %3 = arith.cmpi eq, %arg1, %c0_i32 : i32
    %4 = arith.extui %3 : i1 to i32
    %c0_i32_3 = arith.constant 0 : i32
    %5 = arith.cmpi ne, %4, %c0_i32_3 : i32
    scf.if %5 {
      %c0_8 = arith.constant 0 : index
      %c0_9 = arith.constant 0 : index
      %12 = vector.load %arg6[%c0_8, %c0_9] : memref<384x128xf32, #tpu.memory_space<vmem>>, vector<384x128xf32>
      tpu.vector_store %arg6[%c0_8, %c0_9], %2 {strides = array<i32>} : memref<384x128xf32, #tpu.memory_space<vmem>>, vector<384x128xf32>,
    } else {
    }
    %c0_i32_4 = arith.constant 0 : i32
    %6 = arith.cmpi sgt, %arg1, %c0_i32_4 : i32
    %7 = arith.extui %6 : i1 to i32
    %c0_i32_5 = arith.constant 0 : i32
    %8 = arith.cmpi ne, %7, %c0_i32_5 : i32
    scf.if %8 {
      %c0_8 = arith.constant 0 : index
      %c0_9 = arith.constant 0 : index
      %12 = vector.load %arg6[%c0_8, %c0_9] : memref<384x128xf32, #tpu.memory_space<vmem>>, vector<384x128xf32>
      %13 = arith.addf %12, %2 : vector<384x128xf32>
      %c0_10 = arith.constant 0 : index
      %c0_11 = arith.constant 0 : index
      %14 = vector.load %arg6[%c0_10, %c0_11] : memref<384x128xf32, #tpu.memory_space<vmem>>, vector<384x128xf32>
      tpu.vector_store %arg6[%c0_10, %c0_11], %13 {strides = array<i32>} : memref<384x128xf32, #tpu.memory_space<vmem>>, vector<384x128xf32>,
    } else {
    }
    %c0_i32_6 = arith.constant 0 : i32
    %9 = arith.cmpi eq, %arg1, %c0_i32_6 : i32
    %10 = arith.extui %9 : i1 to i32
    %c0_i32_7 = arith.constant 0 : i32
    %11 = arith.cmpi ne, %10, %c0_i32_7 : i32
    scf.if %11 {
      %c0_8 = arith.constant 0 : index
      %c0_9 = arith.constant 0 : index
      %12 = vector.load %arg6[%c0_8, %c0_9] : memref<384x128xf32, #tpu.memory_space<vmem>>, vector<384x128xf32>
      %13 = arith.truncf %12 : vector<384x128xf32> to vector<384x128xbf16>
      %c0_10 = arith.constant 0 : index
      %c0_11 = arith.constant 0 : index
      %14 = vector.load %arg5[%c0_10, %c0_11] : memref<384x128xbf16, #tpu.memory_space<vmem>>, vector<384x128xbf16>
      tpu.vector_store %arg5[%c0_10, %c0_11], %13 {strides = array<i32>} : memref<384x128xbf16, #tpu.memory_space<vmem>>, vector<384x128xbf16>,
    } else {
    }
    return
  }
  func.func @transform_0(%arg0: i32, %arg1: i32) -> (i32, i32) {
    %c0_i32 = arith.constant 0 : i32
    return %arg0, %arg1 : i32, i32
  }
  func.func @transform_1(%arg0: i32, %arg1: i32) -> (i32, i32) {
    %c0_i32 = arith.constant 0 : i32
    %c0_i32_0 = arith.constant 0 : i32
    return %arg1, %c0_i32 : i32, i32
  }
  func.func @transform_2(%arg0: i32, %arg1: i32) -> (i32, i32) {
    %c0_i32 = arith.constant 0 : i32
    %c0_i32_0 = arith.constant 0 : i32
    %c0_i32_1 = arith.constant 0 : i32
    return %c0_i32, %c0_i32_0 : i32, i32
  }
  func.func @transform_3(%arg0: i32, %arg1: i32) -> (i32, i32) {
    %c0_i32 = arith.constant 0 : i32
    %c0_i32_0 = arith.constant 0 : i32
    return %arg0, %c0_i32 : i32, i32
  }
}

</mosaic_0001>

<bundles_post_ra>
// kernel: tpu_custom_call.1
= control target key start
LH: loop header
LB: loop body
LE: loop exit
PB: predicated region body
PF: predicated region fallthrough
CT: control target
= control target key end

     0   :  { %8 = vsyncpa [#allocation4], 0  ;;  %s2476_s0 = inlined_call_operand.hbm [shape: bf16[384,384], index: 0, kind: input, shape index: {}]   ;;  %s2477_s1 = inlined_call_operand.hbm [shape: bf16[384,128], index: 1, kind: input, shape index: {}]   ;;  %s2478_s2 = inlined_call_operand.vmem [shape: f32[1,128], index: 2, kind: input, shape index: {}]   ;;  %s2479_s3 = inlined_call_operand.hbm [shape: bf16[384,128], index: 3, kind: output, shape index: {}]  }
   0x1   :  { %9 = vsyncpa [#allocation7], 0 }
   0x2   :  { %10 = vsyncpa [#allocation5], 0  ;;  %s2338_s12 = smov [#allocation3]   ;;  %s2266_s16 = scalar_lea.hbm %s2476_s0, 9216 }
   0x3   :  { %s16_s13 = sshll.u32 %s2338_s12, 4  ;;  %p2267_p0 = scmp.ne.s32.totalorder %s2476_s0, %s2266_s16  ;;  %s17_s13 = int_to_ptr.vmem [resolvable:$true] %s16_s13 }
   0x4   :  { %p2270_p1 = scmp.lt.u32.totalorder %s2266_s16, %s2476_s0 }
   0x6   :  { %p2272_p2 = pnand %p2270_p1, %p2267_p0 }
   0x8   :  { %2275 = shalt.err (!%p2272_p2)
}
   0x9   :  { %s2276_s2 = scalar_lea.vmem %s17_s13, 9216  ;;  %p2281_p4 = scmp.lt.s32.totalorder %s17_s13, %s17_s13 }
   0xa   :  { %p2277_p3 = scmp.ne.s32.totalorder %s17_s13, %s2276_s2  ;;  %p2282_p5 = scmp.lt.s32.totalorder %s2276_s2, %s2276_s2 }
   0xc   :  { %p2283_p6 = por %p2282_p5, %p2281_p4 }
   0xe   :  { %p2284_p7 = pnand %p2283_p6, %p2277_p3 }
  0x10   :  { %2287 = shalt.err (!%p2284_p7)
}
  0x11   :  { %s2339_s21 = smov 192   ;;  %s2340_s22 = smov 12  }
  0x12   :  { %22 = dma.hbm_to_vmem [thread:$0]  %s2476_s0, 9216, %s17_s13, [#allocation4], %s2339_s21, %s2339_s21, %s2340_s22  }
  0x13   :  { %s2341_s25 = smov [#allocation6]   ;;  %s2288_s29 = scalar_lea.hbm %s2477_s1, 3072 }
  0x14   :  { %s28_s26 = sshll.u32 %s2341_s25, 4  ;;  %p2289_p8 = scmp.ne.s32.totalorder %s2477_s1, %s2288_s29  ;;  %s29_s26 = int_to_ptr.vmem [resolvable:$true] %s28_s26 }
  0x15   :  { %p2292_p9 = scmp.lt.u32.totalorder %s2288_s29, %s2477_s1 }
  0x17   :  { %p2294_p10 = pnand %p2292_p9, %p2289_p8 }
  0x19   :  { %2297 = shalt.err (!%p2294_p10)
}
  0x1a   :  { %s2298_s7 = scalar_lea.vmem %s29_s26, 3072  ;;  %p2303_p12 = scmp.lt.s32.totalorder %s29_s26, %s29_s26 }
  0x1b   :  { %p2299_p11 = scmp.ne.s32.totalorder %s29_s26, %s2298_s7  ;;  %p2304_p13 = scmp.lt.s32.totalorder %s2298_s7, %s2298_s7 }
  0x1d   :  { %p2305_p0 = por %p2304_p13, %p2303_p12 }
  0x1f   :  { %p2306_p1 = pnand %p2305_p0, %p2299_p11 }
  0x21   :  { %2309 = shalt.err (!%p2306_p1)
}
  0x22   :  { %s2342_s0 = smov 64   ;;  %s2343_s8 = smov 4  }
  0x23   :  { %34 = dma.hbm_to_vmem [thread:$0]  %s2477_s1, 3072, %s29_s26, [#allocation7], %s2342_s0, %s2342_s0, %s2343_s8  }
  0x24   :  { %2332 = dma.done.wait [#allocation4], 9216  }
  0x25   :  { %2333 = vsyncadd [#allocation4], 4294958080 }
  0x26   :  { %2334 = dma.done.wait [#allocation7], 3072  }
  0x27   :  { %2335 = vsyncadd [#allocation7], 4294964224  ;;  %v2344_v0 = vmov 0   ;;  %v2146_v1 = vld [vmem:[#allocation6] sm:$0xff]   ;;  %v2147_v2 = vld [vmem:[#allocation6 + $0x8] sm:$0xff]   ;;  %s2345_s1 = smov [#allocation8]  }
  0x28   :  { %716 = vmatprep.subr.bf16.mxu0 %v2344_v0  ;;  %2106 = vmatprep.subr.bf16.mxu1 %v2344_v0  ;;  %v2148_v3 = vld [vmem:[#allocation6 + $0x10] sm:$0xff]   ;;  %v2149_v4 = vld [vmem:[#allocation6 + $0x18] sm:$0xff]   ;;  %v2150_v5 = vld [vmem:[#allocation6 + $0x20] sm:$0xff]   ;;  %s1662_s11 = sshll.u32 %s2345_s1, 4  ;;  %s1663_s11 = int_to_ptr.vmem [resolvable:$true] %s1662_s11 }
  0x29   :  { %717 = vmatpush1.bf16.msra.mxu0 %v2146_v1  ;;  %2122 = vmatpush1.bf16.msra.mxu1 %v2146_v1  ;;  %v2164_v6 = vld [vmem:[#allocation3 + $0x4] ss:$12 sps:$4 sm:$0xff]   ;;  %v2151_v7 = vld [vmem:[#allocation6 + $0x28] sm:$0xff]   ;;  %v2167_v8 = vld [vmem:[#allocation3 + $0x1b4] ss:$12 sps:$4 sm:$0xff]   ;;  %s2310_s12 = scalar_lea.vmem %s1663_s11, 3072  ;;  %p2315_p3 = scmp.lt.s32.totalorder %s1663_s11, %s1663_s11 }
  0x2a   :  { %718 = vmatprep.subr.bf16.mxu0 %v2344_v0  ;;  %2107 = vmatprep.subr.bf16.mxu1 %v2344_v0  ;;  %v2152_v9 = vld [vmem:[#allocation6 + $0x30] sm:$0xff]   ;;  %v2153_v10 = vld [vmem:[#allocation6 + $0x38] sm:$0xff]   ;;  %v2154_v11 = vld [vmem:[#allocation6 + $0x40] sm:$0xff]   ;;  %p2311_p2 = scmp.ne.s32.totalorder %s1663_s11, %s2310_s12  ;;  %p2316_p4 = scmp.lt.s32.totalorder %s2310_s12, %s2310_s12 }
  0x2b   :  { %748 = vmatprep.mubr.bf16.mxu0 %v2164_v6  ;;  %892 = vmatprep.mubr.bf16.mxu1 %v2167_v8  ;;  %v2155_v12 = vld [vmem:[#allocation6 + $0x48] sm:$0xff]   ;;  %v2156_v13 = vld [vmem:[#allocation6 + $0x50] sm:$0xff]   ;;  %v2157_v14 = vld [vmem:[#allocation6 + $0x58] sm:$0xff]  }
  0x2c   :  { %v2158_v15 = vld [vmem:[#allocation6 + $0x60] sm:$0xff]   ;;  %v2159_v16 = vld [vmem:[#allocation6 + $0x68] sm:$0xff]   ;;  %v2160_v17 = vld [vmem:[#allocation6 + $0x70] sm:$0xff]   ;;  %p2317_p5 = por %p2316_p4, %p2315_p3 }
  0x2d   :  { %719 = vmatpush1.bf16.msra.mxu0 %v2147_v2  ;;  %2123 = vmatpush1.bf16.msra.mxu1 %v2147_v2  ;;  %v2161_v18 = vld [vmem:[#allocation6 + $0x78] sm:$0xff]   ;;  %v2162_v19 = vld [vmem:[#allocation3] ss:$12 sps:$4 sm:$0xff]   ;;  %v2176_v25 = vld [vmem:[#allocation6 + $0x90] sm:$0xff]  }
  0x2e   :  { %720 = vmatprep.subr.bf16.mxu0 %v2344_v0  ;;  %2108 = vmatprep.subr.bf16.mxu1 %v2344_v0  ;;  %v2168_v20 = vld [vmem:[#allocation6 + $0x80] sm:$0xff]   ;;  %v2165_v21 = vld [vmem:[#allocation3 + $0x1b0] ss:$12 sps:$4 sm:$0xff]   ;;  %v2169_v22 = vld [vmem:[#allocation6 + $0x88] sm:$0xff]   ;;  %p2318_p6 = pnand %p2317_p5, %p2311_p2 }
  0x2f   :  { %v2170_v23 = vld [vmem:[#allocation3 + $0x1c] ss:$12 sps:$4 sm:$0xff]   ;;  %v2172_v24 = vld [vmem:[#allocation3 + $0x1cc] ss:$12 sps:$4 sm:$0xff]   ;;  %v2177_v28 = vld [vmem:[#allocation3 + $0x34] ss:$12 sps:$4 sm:$0xff]  }
  0x30   :  { %v2174_v26 = vld [vmem:[#allocation3 + $0x18] ss:$12 sps:$4 sm:$0xff]   ;;  %v2175_v27 = vld [vmem:[#allocation3 + $0x1c8] ss:$12 sps:$4 sm:$0xff]   ;;  %v2181_v32 = vld [vmem:[#allocation3 + $0x30] ss:$12 sps:$4 sm:$0xff]  }
  0x31   :  { %721 = vmatpush1.bf16.msra.mxu0 %v2148_v3  ;;  %2124 = vmatpush1.bf16.msra.mxu1 %v2148_v3  ;;  %v2179_v29 = vld [vmem:[#allocation3 + $0x1e4] ss:$12 sps:$4 sm:$0xff]   ;;  %v2183_v30 = vld [vmem:[#allocation6 + $0x98] sm:$0xff]   ;;  %v2182_v33 = vld [vmem:[#allocation3 + $0x1e0] ss:$12 sps:$4 sm:$0xff]  }
  0x32   :  { %722 = vmatprep.subr.bf16.mxu0 %v2344_v0  ;;  %2109 = vmatprep.subr.bf16.mxu1 %v2344_v0  ;;  %v2190_v31 = vld [vmem:[#allocation6 + $0xa0] sm:$0xff]   ;;  %v2184_v34 = vld [vmem:[#allocation3 + $0x4c] ss:$12 sps:$4 sm:$0xff]   ;;  %v2186_v35 = vld [vmem:[#allocation3 + $0x1fc] ss:$12 sps:$4 sm:$0xff]  }
  0x33   :  { %v2191_v36 = vld [vmem:[#allocation6 + $0xa8] sm:$0xff]   ;;  %v2198_v37 = vld [vmem:[#allocation6 + $0xb0] sm:$0xff]   ;;  %v2189_v39 = vld [vmem:[#allocation3 + $0x1f8] ss:$12 sps:$4 sm:$0xff]  }
  0x34   :  { %v2188_v38 = vld [vmem:[#allocation3 + $0x48] ss:$12 sps:$4 sm:$0xff]   ;;  %v2192_v40 = vld [vmem:[#allocation3 + $0x64] ss:$12 sps:$4 sm:$0xff]   ;;  %v2205_v42 = vld [vmem:[#allocation6 + $0xb8] sm:$0xff]  }
  0x35   :  { %723 = vmatpush1.bf16.msra.mxu0 %v2149_v4  ;;  %2125 = vmatpush1.bf16.msra.mxu1 %v2149_v4  ;;  %v2194_v41 = vld [vmem:[#allocation3 + $0x214] ss:$12 sps:$4 sm:$0xff]   ;;  %v2197_v44 = vld [vmem:[#allocation3 + $0x210] ss:$12 sps:$4 sm:$0xff]   ;;  %v2201_v46 = vld [vmem:[#allocation3 + $0x22c] ss:$12 sps:$4 sm:$0xff]  }
  0x36   :  { %724 = vmatprep.subr.bf16.mxu0 %v2344_v0  ;;  %2110 = vmatprep.subr.bf16.mxu1 %v2344_v0  ;;  %v2196_v43 = vld [vmem:[#allocation3 + $0x60] ss:$12 sps:$4 sm:$0xff]   ;;  %v2199_v45 = vld [vmem:[#allocation3 + $0x7c] ss:$12 sps:$4 sm:$0xff]   ;;  %v2203_v47 = vld [vmem:[#allocation3 + $0x78] ss:$12 sps:$4 sm:$0xff]  }
  0x37   :  { %v2204_v48 = vld [vmem:[#allocation3 + $0x228] ss:$12 sps:$4 sm:$0xff]   ;;  %v2209_v51 = vld [vmem:[#allocation3 + $0x90] ss:$12 sps:$4 sm:$0xff]   ;;  %v2210_v52 = vld [vmem:[#allocation3 + $0x20] ss:$12 sps:$4 sm:$0xff]  }
  0x38   :  { %v2206_v49 = vld [vmem:[#allocation3 + $0x94] ss:$12 sps:$4 sm:$0xff]   ;;  %v2211_v53 = vld [vmem:[#allocation3 + $0xac] ss:$12 sps:$4 sm:$0xff]   ;;  %v2215_v56 = vld [vmem:[#allocation3 + $0x50] ss:$12 sps:$4 sm:$0xff]  }
  0x39   :  { %725 = vmatpush1.bf16.msra.mxu0 %v2150_v5  ;;  %2126 = vmatpush1.bf16.msra.mxu1 %v2150_v5  ;;  %v2208_v50 = vld [vmem:[#allocation3 + $0x8] ss:$12 sps:$4 sm:$0xff]   ;;  %v2213_v54 = vld [vmem:[#allocation3 + $0x38] ss:$12 sps:$4 sm:$0xff]   ;;  %v2219_v59 = vld [vmem:[#allocation3 + $0xc0] ss:$12 sps:$4 sm:$0xff]  }
  0x3a   :  { %726 = vmatprep.subr.bf16.mxu0 %v2344_v0  ;;  %2111 = vmatprep.subr.bf16.mxu1 %v2344_v0  ;;  %v2214_v55 = vld [vmem:[#allocation3 + $0xa8] ss:$12 sps:$4 sm:$0xff]   ;;  %v2216_v57 = vld [vmem:[#allocation3 + $0xc4] ss:$12 sps:$4 sm:$0xff]   ;;  %v2220_v60 = vld [vmem:[#allocation3 + $0x80] ss:$12 sps:$4 sm:$0xff]  }
  0x3b   :  { %v2218_v58 = vld [vmem:[#allocation3 + $0x68] ss:$12 sps:$4 sm:$0xff]   ;;  %v2223_v62 = vld [vmem:[#allocation3 + $0x98] ss:$12 sps:$4 sm:$0xff]   ;;  %v2229_v3 = vld [vmem:[#allocation3 + $0xf0] ss:$12 sps:$4 sm:$0xff]  }
  0x3c   :  { %v2221_v61 = vld [vmem:[#allocation3 + $0xdc] ss:$12 sps:$4 sm:$0xff]   ;;  %v2224_v63 = vld [vmem:[#allocation3 + $0xd8] ss:$12 sps:$4 sm:$0xff]   ;;  %v2226_v1 = vld [vmem:[#allocation3 + $0xf4] ss:$12 sps:$4 sm:$0xff]  }
  0x3d   :  { %727 = vmatpush1.bf16.msra.mxu0 %v2151_v7  ;;  %2127 = vmatpush1.bf16.msra.mxu1 %v2151_v7  ;;  %v2228_v2 = vld [vmem:[#allocation3 + $0xc8] ss:$12 sps:$4 sm:$0xff]   ;;  %v2230_v4 = vld [vmem:[#allocation3 + $0xe0] ss:$12 sps:$4 sm:$0xff]   ;;  %v2233_v6 = vld [vmem:[#allocation3 + $0xf8] ss:$12 sps:$4 sm:$0xff]  }
  0x3e   :  { %728 = vmatprep.subr.bf16.mxu0 %v2344_v0  ;;  %2112 = vmatprep.subr.bf16.mxu1 %v2344_v0  ;;  %v2231_v5 = vld [vmem:[#allocation3 + $0x10c] ss:$12 sps:$4 sm:$0xff]   ;;  %v2234_v7 = vld [vmem:[#allocation3 + $0x108] ss:$12 sps:$4 sm:$0xff]   ;;  %v2235_v8 = vld [vmem:[#allocation3 + $0x110] ss:$12 sps:$4 sm:$0xff]  }
  0x41   :  { %729 = vmatpush1.bf16.msra.mxu0 %v2152_v9  ;;  %2128 = vmatpush1.bf16.msra.mxu1 %v2152_v9  ;;  %v2236_v9 = vld [vmem:[#allocation3 + $0x124] ss:$12 sps:$4 sm:$0xff]  }
  0x42   :  { %730 = vmatprep.subr.bf16.mxu0 %v2344_v0  ;;  %2113 = vmatprep.subr.bf16.mxu1 %v2344_v0 }
  0x45   :  { %731 = vmatpush1.bf16.msra.mxu0 %v2153_v10  ;;  %2129 = vmatpush1.bf16.msra.mxu1 %v2153_v10  ;;  %v2238_v10 = vld [vmem:[#allocation3 + $0x128] ss:$12 sps:$4 sm:$0xff]  }
  0x46   :  { %732 = vmatprep.subr.bf16.mxu0 %v2344_v0  ;;  %2114 = vmatprep.subr.bf16.mxu1 %v2344_v0 }
  0x49   :  { %733 = vmatpush1.bf16.msra.mxu0 %v2154_v11  ;;  %2130 = vmatpush1.bf16.msra.mxu1 %v2154_v11  ;;  %v2239_v11 = vld [vmem:[#allocation3 + $0x120] ss:$12 sps:$4 sm:$0xff]  }
  0x4a   :  { %734 = vmatprep.subr.bf16.mxu0 %v2344_v0  ;;  %2115 = vmatprep.subr.bf16.mxu1 %v2344_v0 }
  0x4d   :  { %735 = vmatpush1.bf16.msra.mxu0 %v2155_v12  ;;  %2131 = vmatpush1.bf16.msra.mxu1 %v2155_v12  ;;  %v2240_v12 = vld [vmem:[#allocation3 + $0x140] ss:$12 sps:$4 sm:$0xff]  }
  0x4e   :  { %736 = vmatprep.subr.bf16.mxu0 %v2344_v0  ;;  %2116 = vmatprep.subr.bf16.mxu1 %v2344_v0 }
  0x51   :  { %737 = vmatpush1.bf16.msra.mxu0 %v2156_v13  ;;  %2132 = vmatpush1.bf16.msra.mxu1 %v2156_v13  ;;  %v2241_v13 = vld [vmem:[#allocation3 + $0x13c] ss:$12 sps:$4 sm:$0xff]  }
  0x52   :  { %738 = vmatprep.subr.bf16.mxu0 %v2344_v0  ;;  %2117 = vmatprep.subr.bf16.mxu1 %v2344_v0 }
  0x55   :  { %739 = vmatpush1.bf16.msra.mxu0 %v2157_v14  ;;  %2133 = vmatpush1.bf16.msra.mxu1 %v2157_v14  ;;  %v2243_v14 = vld [vmem:[#allocation3 + $0x158] ss:$12 sps:$4 sm:$0xff]  }
  0x56   :  { %740 = vmatprep.subr.bf16.mxu0 %v2344_v0  ;;  %2118 = vmatprep.subr.bf16.mxu1 %v2344_v0 }
  0x59   :  { %741 = vmatpush1.bf16.msra.mxu0 %v2158_v15  ;;  %2134 = vmatpush1.bf16.msra.mxu1 %v2158_v15  ;;  %v2244_v15 = vld [vmem:[#allocation3 + $0x138] ss:$12 sps:$4 sm:$0xff]  }
  0x5a   :  { %742 = vmatprep.subr.bf16.mxu0 %v2344_v0  ;;  %2119 = vmatprep.subr.bf16.mxu1 %v2344_v0 }
  0x5d   :  { %743 = vmatpush1.bf16.msra.mxu0 %v2159_v16  ;;  %2135 = vmatpush1.bf16.msra.mxu1 %v2159_v16  ;;  %v2245_v16 = vld [vmem:[#allocation3 + $0x170] ss:$12 sps:$4 sm:$0xff]  }
  0x5e   :  { %744 = vmatprep.subr.bf16.mxu0 %v2344_v0  ;;  %2120 = vmatprep.subr.bf16.mxu1 %v2344_v0 }
  0x61   :  { %745 = vmatpush1.bf16.msra.mxu0 %v2160_v17  ;;  %2136 = vmatpush1.bf16.msra.mxu1 %v2160_v17  ;;  %v2246_v17 = vld [vmem:[#allocation3 + $0x154] ss:$12 sps:$4 sm:$0xff]  }
  0x62   :  { %746 = vmatprep.subr.bf16.mxu0 %v2344_v0  ;;  %2121 = vmatprep.subr.bf16.mxu1 %v2344_v0  ;;  %v2225_v0 = vld [vmem:[#allocation3 + $0xb0] ss:$12 sps:$4 sm:$0xff]  }
  0x65   :  { %747 = vmatpush1.bf16.msra.mxu0 %v2161_v18  ;;  %2137 = vmatpush1.bf16.msra.mxu1 %v2161_v18  ;;  %v2248_v18 = vld [vmem:[#allocation3 + $0x188] ss:$12 sps:$4 sm:$0xff]  }
  0x66   :  { %2042 = vmatprep.subr.bf16.mxu1 %v2168_v20 }
  0x68   :  { %749 = vmatmul.mubr.bf16.vlgmr.msra.gmra.mrb[0].mxu0 %v2162_v19  ;;  %893 = vmatmul.mubr.bf16.vlgmr.msra.gmra.mrb[0].mxu1 %v2165_v21  ;;  %v2249_v19 = vld [vmem:[#allocation3 + $0x150] ss:$12 sps:$4 sm:$0xff]   ;;  %v2251_v21 = vld [vmem:[#allocation3 + $0x16c] ss:$12 sps:$4 sm:$0xff]  }
  0x69   :  { %2043 = vmatpush3.bf16.msra.mxu1 %v2168_v20  ;;  %756 = vmatprep.mubr.bf16.mxu0 %v2170_v23  ;;  %v2250_v20 = vld [vmem:[#allocation3 + $0x1a0] ss:$12 sps:$4 sm:$0xff]   ;;  %v2254_v23 = vld [vmem:[#allocation3 + $0x168] ss:$12 sps:$4 sm:$0xff]  }
  0x6a   :  { %2044 = vmatprep.subr.bf16.mxu1 %v2169_v22  ;;  %900 = vmatprep.mubr.bf16.mxu1 %v2172_v24  ;;  %v2255_v24 = vld [vmem:[#allocation3 + $0x1d0] ss:$12 sps:$4 sm:$0xff]  }
  0x6d   :  { %2045 = vmatpush3.bf16.msra.mxu1 %v2169_v22  ;;  %v2253_v22 = vld [vmem:[#allocation3 + $0x1b8] ss:$12 sps:$4 sm:$0xff]  }
  0x6e   :  { %2046 = vmatprep.subr.bf16.mxu1 %v2176_v25 }
  0x70   :  { %757 = vmatmul.mubr.bf16.gmra.mrb[4].mxu0 %v2174_v26  ;;  %901 = vmatmul.mubr.bf16.gmra.mrb[4].mxu1 %v2175_v27  ;;  %v2258_v26 = vld [vmem:[#allocation3 + $0x1e8] ss:$12 sps:$4 sm:$0xff]   ;;  %v2259_v27 = vld [vmem:[#allocation3 + $0x180] ss:$12 sps:$4 sm:$0xff]  }
  0x71   :  { %2047 = vmatpush3.bf16.msra.mxu1 %v2176_v25  ;;  %764 = vmatprep.mubr.bf16.mxu0 %v2177_v28  ;;  %v2256_v25 = vld [vmem:[#allocation3 + $0x184] ss:$12 sps:$4 sm:$0xff]   ;;  %v2260_v28 = vld [vmem:[#allocation3 + $0x200] ss:$12 sps:$4 sm:$0xff]  }
  0x72   :  { %908 = vmatprep.mubr.bf16.mxu1 %v2179_v29  ;;  %2048 = vmatprep.subr.bf16.mxu1 %v2183_v30  ;;  %v2261_v29 = vld [vmem:[#allocation3 + $0x19c] ss:$12 sps:$4 sm:$0xff]  }
  0x75   :  { %2049 = vmatpush3.bf16.msra.mxu1 %v2183_v30  ;;  %v2263_v30 = vld [vmem:[#allocation3 + $0x218] ss:$12 sps:$4 sm:$0xff]  }
  0x76   :  { %2050 = vmatprep.subr.bf16.mxu1 %v2190_v31 }
  0x78   :  { %765 = vmatmul.mubr.bf16.gmra.mrb[8].mxu0 %v2181_v32  ;;  %909 = vmatmul.mubr.bf16.gmra.mrb[8].mxu1 %v2182_v33  ;;  %v2265_v32 = vld [vmem:[#allocation3 + $0x230] ss:$12 sps:$4 sm:$0xff]  }
  0x79   :  { %772 = vmatprep.mubr.bf16.mxu0 %v2184_v34  ;;  %916 = vmatprep.mubr.bf16.mxu1 %v2186_v35 }
  0x7a   :  { %2051 = vmatpush3.bf16.msra.mxu1 %v2190_v31  ;;  %v2264_v31 = vld [vmem:[#allocation3 + $0x198] ss:$12 sps:$4 sm:$0xff]  }
  0x7b   :  { %2052 = vmatprep.subr.bf16.mxu1 %v2191_v36 }
  0x7e   :  { %2053 = vmatpush3.bf16.msra.mxu1 %v2191_v36 }
  0x7f   :  { %2054 = vmatprep.subr.bf16.mxu1 %v2198_v37 }
  0x80   :  { %773 = vmatmul.mubr.bf16.gmra.mrb[12].mxu0 %v2188_v38  ;;  %917 = vmatmul.mubr.bf16.gmra.mrb[12].mxu1 %v2189_v39 }
  0x81   :  { %780 = vmatprep.mubr.bf16.mxu0 %v2192_v40  ;;  %924 = vmatprep.mubr.bf16.mxu1 %v2194_v41 }
  0x82   :  { %2055 = vmatpush3.bf16.msra.mxu1 %v2198_v37 }
  0x83   :  { %2056 = vmatprep.subr.bf16.mxu1 %v2205_v42 }
  0x86   :  { %2057 = vmatpush3.bf16.msra.mxu1 %v2205_v42 }
  0x88   :  { %781 = vmatmul.mubr.bf16.gmra.mrb[16].mxu0 %v2196_v43  ;;  %925 = vmatmul.mubr.bf16.gmra.mrb[16].mxu1 %v2197_v44 }
  0x89   :  { %788 = vmatprep.mubr.bf16.mxu0 %v2199_v45  ;;  %932 = vmatprep.mubr.bf16.mxu1 %v2201_v46 }
  0x90   :  { %789 = vmatmul.mubr.bf16.gmra.mrb[20].mxu0 %v2203_v47  ;;  %933 = vmatmul.mubr.bf16.gmra.mrb[20].mxu1 %v2204_v48 }
  0x91   :  { %796 = vmatprep.mubr.bf16.mxu0 %v2206_v49  ;;  %2058 = vmatprep.mubr.bf16.mxu1 %v2208_v50 }
  0x98   :  { %797 = vmatmul.mubr.bf16.gmra.mrb[24].mxu0 %v2209_v51  ;;  %2059 = vmatmul.mubr.bf16.vlgmr.msra.gmra.mrb[24].mxu1 %v2210_v52 }
  0x99   :  { %804 = vmatprep.mubr.bf16.mxu0 %v2211_v53  ;;  %2062 = vmatprep.mubr.bf16.mxu1 %v2213_v54 }
  0xa0   :  { %805 = vmatmul.mubr.bf16.gmra.mrb[28].mxu0 %v2214_v55  ;;  %2063 = vmatmul.mubr.bf16.gmra.mrb[28].mxu1 %v2215_v56 }
  0xa1   :  { %812 = vmatprep.mubr.bf16.mxu0 %v2216_v57  ;;  %2066 = vmatprep.mubr.bf16.mxu1 %v2218_v58 }
  0xa8   :  { %813 = vmatmul.mubr.bf16.gmra.mrb[32].mxu0 %v2219_v59  ;;  %2067 = vmatmul.mubr.bf16.gmra.mrb[32].mxu1 %v2220_v60 }
  0xa9   :  { %820 = vmatprep.mubr.bf16.mxu0 %v2221_v61  ;;  %2070 = vmatprep.mubr.bf16.mxu1 %v2223_v62 }
  0xb0   :  { %821 = vmatmul.mubr.bf16.gmra.mrb[36].mxu0 %v2224_v63  ;;  %2071 = vmatmul.mubr.bf16.gmra.mrb[36].mxu1 %v2225_v0 }
  0xb1   :  { %828 = vmatprep.mubr.bf16.mxu0 %v2226_v1  ;;  %2074 = vmatprep.mubr.bf16.mxu1 %v2228_v2 }
  0xb8   :  { %829 = vmatmul.mubr.bf16.gmra.mrb[40].mxu0 %v2229_v3  ;;  %2075 = vmatmul.mubr.bf16.gmra.mrb[40].mxu1 %v2230_v4 }
  0xb9   :  { %836 = vmatprep.mubr.bf16.mxu0 %v2231_v5  ;;  %2078 = vmatprep.mubr.bf16.mxu1 %v2233_v6 }
  0xc0   :  { %837 = vmatmul.mubr.bf16.gmra.mrb[44].mxu0 %v2234_v7  ;;  %2079 = vmatmul.mubr.bf16.gmra.mrb[44].mxu1 %v2235_v8 }
  0xc1   :  { %844 = vmatprep.mubr.bf16.mxu0 %v2236_v9  ;;  %2082 = vmatprep.mubr.bf16.mxu1 %v2238_v10 }
  0xc8   :  { %845 = vmatmul.mubr.bf16.gmra.mrb[48].mxu0 %v2239_v11  ;;  %2083 = vmatmul.mubr.bf16.gmra.mrb[48].mxu1 %v2240_v12 }
  0xc9   :  { %852 = vmatprep.mubr.bf16.mxu0 %v2241_v13  ;;  %2086 = vmatprep.mubr.bf16.mxu1 %v2243_v14 }
  0xd0   :  { %853 = vmatmul.mubr.bf16.gmra.mrb[52].mxu0 %v2244_v15  ;;  %2087 = vmatmul.mubr.bf16.gmra.mrb[52].mxu1 %v2245_v16 }
  0xd1   :  { %860 = vmatprep.mubr.bf16.mxu0 %v2246_v17  ;;  %2090 = vmatprep.mubr.bf16.mxu1 %v2248_v18 }
  0xd8   :  { %861 = vmatmul.mubr.bf16.gmra.mrb[56].mxu0 %v2249_v19  ;;  %2091 = vmatmul.mubr.bf16.gmra.mrb[56].mxu1 %v2250_v20 }
  0xd9   :  { %868 = vmatprep.mubr.bf16.mxu0 %v2251_v21  ;;  %2094 = vmatprep.mubr.bf16.mxu1 %v2253_v22 }
  0xe0   :  { %869 = vmatmul.mubr.bf16.gmra.mrb[60].mxu0 %v2254_v23  ;;  %2095 = vmatmul.mubr.bf16.gmra.mrb[60].mxu1 %v2255_v24 }
  0xe1   :  { %876 = vmatprep.mubr.bf16.mxu0 %v2256_v25  ;;  %2098 = vmatprep.mubr.bf16.mxu1 %v2258_v26 }
  0xe8   :  { %877 = vmatmul.mubr.bf16.gmra.mrb[64].mxu0 %v2259_v27  ;;  %2099 = vmatmul.mubr.bf16.gmra.mrb[64].mxu1 %v2260_v28 }
  0xe9   :  { %884 = vmatprep.mubr.bf16.mxu0 %v2261_v29  ;;  %2102 = vmatprep.mubr.bf16.mxu1 %v2263_v30 }
  0xf0   :  { %885 = vmatmul.mubr.bf16.gmra.mrb[68].mxu0 %v2264_v31  ;;  %2103 = vmatmul.mubr.bf16.gmra.mrb[68].mxu1 %v2265_v32 }
 0x13b   :  { %v750_v33 = vpop.f32.mrb[0].mxu0  ;;  %v2425_v34 = vpop.f32.mrb[0].mxu1 }
 0x13c   :  { %v752_v35 = vpop.f32.mrb[1].mxu0  ;;  %v896_v36 = vpop.f32.mrb[1].mxu1 }
 0x13d   :  { %v753_v37 = vpop.f32.mrb[2].mxu0  ;;  %v2427_v38 = vpop.f32.mrb[2].mxu1 }
 0x13e   :  { %v755_v39 = vpop.f32.mrb[3].mxu0  ;;  %v899_v40 = vpop.f32.mrb[3].mxu1 }
 0x143   :  { %v758_v41 = vpop.f32.mrb[4].mxu0  ;;  %v2429_v42 = vpop.f32.mrb[4].mxu1 }
 0x144   :  { %v760_v43 = vpop.f32.mrb[5].mxu0  ;;  %v904_v44 = vpop.f32.mrb[5].mxu1 }
 0x145   :  { %v761_v45 = vpop.f32.mrb[6].mxu0  ;;  %v2431_v46 = vpop.f32.mrb[6].mxu1 }
 0x146   :  { %v763_v47 = vpop.f32.mrb[7].mxu0  ;;  %v907_v48 = vpop.f32.mrb[7].mxu1 }
 0x14b   :  { %v766_v49 = vpop.f32.mrb[8].mxu0  ;;  %v2433_v50 = vpop.f32.mrb[8].mxu1 }
 0x14c   :  { %v768_v51 = vpop.f32.mrb[9].mxu0  ;;  %v912_v52 = vpop.f32.mrb[9].mxu1 }
 0x14d   :  { %v769_v53 = vpop.f32.mrb[10].mxu0  ;;  %v2435_v54 = vpop.f32.mrb[10].mxu1 }
 0x14e   :  { %v771_v55 = vpop.f32.mrb[11].mxu0  ;;  %v915_v56 = vpop.f32.mrb[11].mxu1 }
 0x153   :  { %v774_v57 = vpop.f32.mrb[12].mxu0  ;;  %v2437_v58 = vpop.f32.mrb[12].mxu1 }
 0x154   :  { %v776_v59 = vpop.f32.mrb[13].mxu0  ;;  %v920_v60 = vpop.f32.mrb[13].mxu1 }
 0x155   :  { %v777_v61 = vpop.f32.mrb[14].mxu0  ;;  %v2439_v62 = vpop.f32.mrb[14].mxu1 }
 0x156   :  { %v779_v63 = vpop.f32.mrb[15].mxu0  ;;  %v923_v0 = vpop.f32.mrb[15].mxu1 }
 0x15b   :  { %v782_v1 = vpop.f32.mrb[16].mxu0  ;;  %v2441_v2 = vpop.f32.mrb[16].mxu1 }
 0x15c   :  { %v784_v3 = vpop.f32.mrb[17].mxu0  ;;  %v928_v4 = vpop.f32.mrb[17].mxu1 }
 0x15d   :  { %v785_v5 = vpop.f32.mrb[18].mxu0  ;;  %v2443_v6 = vpop.f32.mrb[18].mxu1 }
 0x15e   :  { %v787_v7 = vpop.f32.mrb[19].mxu0  ;;  %v931_v8 = vpop.f32.mrb[19].mxu1 }
 0x163   :  { %v790_v9 = vpop.f32.mrb[20].mxu0  ;;  %v2445_v10 = vpop.f32.mrb[20].mxu1 }
 0x164   :  { %v792_v11 = vpop.f32.mrb[21].mxu0  ;;  %v936_v12 = vpop.f32.mrb[21].mxu1 }
 0x165   :  { %v793_v13 = vpop.f32.mrb[22].mxu0  ;;  %v2447_v14 = vpop.f32.mrb[22].mxu1 }
 0x166   :  { %v795_v15 = vpop.f32.mrb[23].mxu0  ;;  %v939_v16 = vpop.f32.mrb[23].mxu1 }
 0x16b   :  { %v798_v17 = vpop.f32.mrb[24].mxu0  ;;  %v2060_v18 = vpop.f32.mrb[24].mxu1 }
 0x16c   :  { %v984_v19 = vadd.f32 %v2060_v18, %v758_v41  ;;  %v800_v20 = vpop.f32.mrb[25].mxu0  ;;  %v975_v21 = vpop.f32.mrb[25].mxu1 }
 0x16d   :  { %v976_v22 = vadd.f32 %v975_v21, %v750_v33  ;;  %v801_v23 = vpop.f32.mrb[26].mxu0  ;;  %v2061_v24 = vpop.f32.mrb[26].mxu1 }
 0x16e   :  { %v987_v25 = vadd.f32 %v2061_v24, %v761_v45  ;;  %v803_v26 = vpop.f32.mrb[27].mxu0  ;;  %v978_v27 = vpop.f32.mrb[27].mxu1 }
 0x16f   :  { %v979_v28 = vadd.f32 %v978_v27, %v753_v37 }
 0x170   :  { %v1875_v29 = vpack.c.bf16 %v987_v25, %v984_v19 }
 0x171   :  { %v1870_v30 = vpack.c.bf16 %v979_v28, %v976_v22 }
 0x172   :  { %1987 = vst [vmem:[#allocation8 + $0x8] sm:$0xff] %v1875_v29  }
 0x173   :  { %1871 = vst [vmem:[#allocation8] sm:$0xff] %v1870_v30   ;;  %v806_v31 = vpop.f32.mrb[28].mxu0  ;;  %v2064_v32 = vpop.f32.mrb[28].mxu1 }
 0x174   :  { %v1000_v35 = vadd.f32 %v2064_v32, %v774_v57  ;;  %v808_v36 = vpop.f32.mrb[29].mxu0  ;;  %v991_v39 = vpop.f32.mrb[29].mxu1 }
 0x175   :  { %v992_v40 = vadd.f32 %v991_v39, %v766_v49  ;;  %v809_v41 = vpop.f32.mrb[30].mxu0  ;;  %v2065_v43 = vpop.f32.mrb[30].mxu1 }
 0x176   :  { %v1003_v44 = vadd.f32 %v2065_v43, %v777_v61  ;;  %v811_v33 = vpop.f32.mrb[31].mxu0  ;;  %v994_v47 = vpop.f32.mrb[31].mxu1 }
 0x177   :  { %v995_v48 = vadd.f32 %v994_v47, %v769_v53 }
 0x178   :  { %v1885_v45 = vpack.c.bf16 %v1003_v44, %v1000_v35 }
 0x179   :  { %v1880_v51 = vpack.c.bf16 %v995_v48, %v992_v40 }
 0x17a   :  { %1989 = vst [vmem:[#allocation8 + $0x18] sm:$0xff] %v1885_v45  }
 0x17b   :  { %1988 = vst [vmem:[#allocation8 + $0x10] sm:$0xff] %v1880_v51   ;;  %v814_v37 = vpop.f32.mrb[32].mxu0  ;;  %v2068_v52 = vpop.f32.mrb[32].mxu1 }
 0x17c   :  { %v1016_v55 = vadd.f32 %v2068_v52, %v790_v9  ;;  %v816_v56 = vpop.f32.mrb[33].mxu0  ;;  %v1007_v59 = vpop.f32.mrb[33].mxu1 }
 0x17d   :  { %v1008_v60 = vadd.f32 %v1007_v59, %v782_v1  ;;  %v817_v57 = vpop.f32.mrb[34].mxu0  ;;  %v2069_v63 = vpop.f32.mrb[34].mxu1 }
 0x17e   :  { %v1019_v0 = vadd.f32 %v2069_v63, %v793_v13  ;;  %v819_v49 = vpop.f32.mrb[35].mxu0  ;;  %v1010_v3 = vpop.f32.mrb[35].mxu1 }
 0x17f   :  { %v1011_v4 = vadd.f32 %v1010_v3, %v785_v5 }
 0x180   :  { %v1895_v61 = vpack.c.bf16 %v1019_v0, %v1016_v55 }
 0x181   :  { %v1890_v7 = vpack.c.bf16 %v1011_v4, %v1008_v60 }
 0x182   :  { %1991 = vst [vmem:[#allocation8 + $0x28] sm:$0xff] %v1895_v61  }
 0x183   :  { %1990 = vst [vmem:[#allocation8 + $0x20] sm:$0xff] %v1890_v7   ;;  %v822_v53 = vpop.f32.mrb[36].mxu0  ;;  %v2072_v8 = vpop.f32.mrb[36].mxu1 }
 0x184   :  { %v1032_v11 = vadd.f32 %v2072_v8, %v806_v31  ;;  %v824_v12 = vpop.f32.mrb[37].mxu0  ;;  %v1023_v15 = vpop.f32.mrb[37].mxu1 }
 0x185   :  { %v1024_v16 = vadd.f32 %v1023_v15, %v798_v17  ;;  %v825_v9 = vpop.f32.mrb[38].mxu0  ;;  %v2073_v18 = vpop.f32.mrb[38].mxu1 }
 0x186   :  { %v1035_v19 = vadd.f32 %v2073_v18, %v809_v41  ;;  %v827_v1 = vpop.f32.mrb[39].mxu0  ;;  %v1026_v20 = vpop.f32.mrb[39].mxu1 }
 0x187   :  { %v1027_v21 = vadd.f32 %v1026_v20, %v801_v23 }
 0x188   :  { %v1905_v13 = vpack.c.bf16 %v1035_v19, %v1032_v11 }
 0x189   :  { %v1900_v22 = vpack.c.bf16 %v1027_v21, %v1024_v16 }
 0x18a   :  { %1993 = vst [vmem:[#allocation8 + $0x38] sm:$0xff] %v1905_v13  }
 0x18b   :  { %1992 = vst [vmem:[#allocation8 + $0x30] sm:$0xff] %v1900_v22   ;;  %v830_v5 = vpop.f32.mrb[40].mxu0  ;;  %v2076_v24 = vpop.f32.mrb[40].mxu1 }
 0x18c   :  { %v1048_v25 = vadd.f32 %v2076_v24, %v822_v53  ;;  %v832_v26 = vpop.f32.mrb[41].mxu0  ;;  %v1039_v27 = vpop.f32.mrb[41].mxu1 }
 0x18d   :  { %v1040_v28 = vadd.f32 %v1039_v27, %v814_v37  ;;  %v833_v29 = vpop.f32.mrb[42].mxu0  ;;  %v2077_v30 = vpop.f32.mrb[42].mxu1 }
 0x18e   :  { %v1051_v31 = vadd.f32 %v2077_v30, %v825_v9  ;;  %v835_v17 = vpop.f32.mrb[43].mxu0  ;;  %v1042_v32 = vpop.f32.mrb[43].mxu1 }
 0x18f   :  { %v1043_v35 = vadd.f32 %v1042_v32, %v817_v57 }
 0x190   :  { %v1915_v36 = vpack.c.bf16 %v1051_v31, %v1048_v25 }
 0x191   :  { %v1910_v39 = vpack.c.bf16 %v1043_v35, %v1040_v28 }
 0x192   :  { %1995 = vst [vmem:[#allocation8 + $0x48] sm:$0xff] %v1915_v36  }
 0x193   :  { %1994 = vst [vmem:[#allocation8 + $0x40] sm:$0xff] %v1910_v39   ;;  %v838_v23 = vpop.f32.mrb[44].mxu0  ;;  %v2080_v40 = vpop.f32.mrb[44].mxu1 }
 0x194   :  { %v1064_v41 = vadd.f32 %v2080_v40, %v838_v23  ;;  %v840_v43 = vpop.f32.mrb[45].mxu0  ;;  %v1055_v44 = vpop.f32.mrb[45].mxu1 }
 0x195   :  { %v1056_v33 = vadd.f32 %v1055_v44, %v830_v5  ;;  %v841_v47 = vpop.f32.mrb[46].mxu0  ;;  %v2081_v48 = vpop.f32.mrb[46].mxu1 }
 0x196   :  { %v1067_v45 = vadd.f32 %v2081_v48, %v841_v47  ;;  %v843_v51 = vpop.f32.mrb[47].mxu0  ;;  %v1058_v37 = vpop.f32.mrb[47].mxu1 }
 0x197   :  { %v1059_v52 = vadd.f32 %v1058_v37, %v833_v29 }
 0x198   :  { %v1925_v55 = vpack.c.bf16 %v1067_v45, %v1064_v41 }
 0x199   :  { %v1920_v56 = vpack.c.bf16 %v1059_v52, %v1056_v33 }
 0x19a   :  { %1997 = vst [vmem:[#allocation8 + $0x58] sm:$0xff] %v1925_v55  }
 0x19b   :  { %1996 = vst [vmem:[#allocation8 + $0x50] sm:$0xff] %v1920_v56   ;;  %v846_v59 = vpop.f32.mrb[48].mxu0  ;;  %v2084_v60 = vpop.f32.mrb[48].mxu1 }
 0x19c   :  { %v848_v57 = vpop.f32.mrb[49].mxu0  ;;  %v1071_v63 = vpop.f32.mrb[49].mxu1 }
 0x19d   :  { %v1072_v0 = vadd.f32 %v1071_v63, %v846_v59  ;;  %v849_v49 = vpop.f32.mrb[50].mxu0  ;;  %v2085_v3 = vpop.f32.mrb[50].mxu1 }
 0x19e   :  { %v851_v4 = vpop.f32.mrb[51].mxu0  ;;  %v1074_v61 = vpop.f32.mrb[51].mxu1 }
 0x19f   :  { %v1075_v7 = vadd.f32 %v1074_v61, %v849_v49 }
 0x1a1   :  { %v1930_v53 = vpack.c.bf16 %v1075_v7, %v1072_v0 }
 0x1a3   :  { %1998 = vst [vmem:[#allocation8 + $0x60] sm:$0xff] %v1930_v53   ;;  %v854_v8 = vpop.f32.mrb[52].mxu0  ;;  %v2088_v11 = vpop.f32.mrb[52].mxu1 }
 0x1a4   :  { %v1080_v12 = vadd.f32 %v2084_v60, %v854_v8  ;;  %v856_v15 = vpop.f32.mrb[53].mxu0  ;;  %v1087_v16 = vpop.f32.mrb[53].mxu1 }
 0x1a5   :  { %v857_v9 = vpop.f32.mrb[54].mxu0  ;;  %v2089_v18 = vpop.f32.mrb[54].mxu1 }
 0x1a6   :  { %v1083_v19 = vadd.f32 %v2085_v3, %v857_v9  ;;  %v859_v1 = vpop.f32.mrb[55].mxu0  ;;  %v1090_v20 = vpop.f32.mrb[55].mxu1 }
 0x1a8   :  { %v1935_v21 = vpack.c.bf16 %v1083_v19, %v1080_v12 }
 0x1aa   :  { %1999 = vst [vmem:[#allocation8 + $0x68] sm:$0xff] %v1935_v21  }
 0x1ab   :  { %v862_v13 = vpop.f32.mrb[56].mxu0  ;;  %v2092_v22 = vpop.f32.mrb[56].mxu1 }
 0x1ac   :  { %v1088_v5 = vadd.f32 %v1087_v16, %v862_v13  ;;  %v864_v24 = vpop.f32.mrb[57].mxu0  ;;  %v1103_v25 = vpop.f32.mrb[57].mxu1 }
 0x1ad   :  { %v865_v26 = vpop.f32.mrb[58].mxu0  ;;  %v2093_v27 = vpop.f32.mrb[58].mxu1 }
 0x1ae   :  { %v1091_v28 = vadd.f32 %v1090_v20, %v865_v26  ;;  %v867_v29 = vpop.f32.mrb[59].mxu0  ;;  %v1106_v30 = vpop.f32.mrb[59].mxu1 }
 0x1b0   :  { %v1940_v31 = vpack.c.bf16 %v1091_v28, %v1088_v5 }
 0x1b2   :  { %2000 = vst [vmem:[#allocation8 + $0x70] sm:$0xff] %v1940_v31  }
 0x1b3   :  { %v870_v17 = vpop.f32.mrb[60].mxu0  ;;  %v2096_v32 = vpop.f32.mrb[60].mxu1 }
 0x1b4   :  { %v1096_v35 = vadd.f32 %v2088_v11, %v870_v17  ;;  %v1128_v36 = vadd.f32 %v2096_v32, %v2429_v42  ;;  %v872_v39 = vpop.f32.mrb[61].mxu0  ;;  %v1119_v23 = vpop.f32.mrb[61].mxu1 }
 0x1b5   :  { %v1120_v40 = vadd.f32 %v1119_v23, %v2425_v34  ;;  %v873_v41 = vpop.f32.mrb[62].mxu0  ;;  %v2097_v43 = vpop.f32.mrb[62].mxu1 }
 0x1b6   :  { %v1099_v44 = vadd.f32 %v2089_v18, %v873_v41  ;;  %v1131_v33 = vadd.f32 %v2097_v43, %v2431_v46  ;;  %v875_v47 = vpop.f32.mrb[63].mxu0  ;;  %v1122_v48 = vpop.f32.mrb[63].mxu1 }
 0x1b7   :  { %v1123_v45 = vadd.f32 %v1122_v48, %v2427_v38 }
 0x1b8   :  { %v1945_v51 = vpack.c.bf16 %v1099_v44, %v1096_v35  ;;  %v1965_v37 = vpack.c.bf16 %v1131_v33, %v1128_v36 }
 0x1b9   :  { %v1960_v52 = vpack.c.bf16 %v1123_v45, %v1120_v40 }
 0x1ba   :  { %2001 = vst [vmem:[#allocation8 + $0x78] sm:$0xff] %v1945_v51   ;;  %2005 = vst [vmem:[#allocation8 + $0x98] sm:$0xff] %v1965_v37  }
 0x1bb   :  { %2004 = vst [vmem:[#allocation8 + $0x90] sm:$0xff] %v1960_v52   ;;  %v878_v42 = vpop.f32.mrb[64].mxu0  ;;  %v2100_v55 = vpop.f32.mrb[64].mxu1 }
 0x1bc   :  { %v1104_v56 = vadd.f32 %v1103_v25, %v878_v42  ;;  %v1144_v34 = vadd.f32 %v2100_v55, %v2437_v58  ;;  %v880_v59 = vpop.f32.mrb[65].mxu0  ;;  %v1135_v60 = vpop.f32.mrb[65].mxu1 }
 0x1bd   :  { %v1136_v57 = vadd.f32 %v1135_v60, %v2433_v50  ;;  %v881_v46 = vpop.f32.mrb[66].mxu0  ;;  %v2101_v63 = vpop.f32.mrb[66].mxu1 }
 0x1be   :  { %v1107_v0 = vadd.f32 %v1106_v30, %v881_v46  ;;  %v1147_v38 = vadd.f32 %v2101_v63, %v2439_v62  ;;  %v883_v49 = vpop.f32.mrb[67].mxu0  ;;  %v1138_v3 = vpop.f32.mrb[67].mxu1 }
 0x1bf   :  { %v1139_v4 = vadd.f32 %v1138_v3, %v2435_v54 }
 0x1c0   :  { %v1950_v61 = vpack.c.bf16 %v1107_v0, %v1104_v56  ;;  %v1975_v7 = vpack.c.bf16 %v1147_v38, %v1144_v34 }
 0x1c1   :  { %v1970_v53 = vpack.c.bf16 %v1139_v4, %v1136_v57 }
 0x1c2   :  { %2002 = vst [vmem:[#allocation8 + $0x80] sm:$0xff] %v1950_v61   ;;  %2007 = vst [vmem:[#allocation8 + $0xa8] sm:$0xff] %v1975_v7  }
 0x1c3   :  { %2006 = vst [vmem:[#allocation8 + $0xa0] sm:$0xff] %v1970_v53   ;;  %v886_v58 = vpop.f32.mrb[68].mxu0  ;;  %v2104_v8 = vpop.f32.mrb[68].mxu1 }
 0x1c4   :  { %v1112_v11 = vadd.f32 %v2092_v22, %v886_v58  ;;  %v1160_v50 = vadd.f32 %v2104_v8, %v2445_v10  ;;  %v888_v12 = vpop.f32.mrb[69].mxu0  ;;  %v1151_v15 = vpop.f32.mrb[69].mxu1 }
 0x1c5   :  { %v1152_v16 = vadd.f32 %v1151_v15, %v2441_v2  ;;  %v889_v62 = vpop.f32.mrb[70].mxu0  ;;  %v2105_v9 = vpop.f32.mrb[70].mxu1 }
 0x1c6   :  { %v1115_v18 = vadd.f32 %v2093_v27, %v889_v62  ;;  %v1163_v54 = vadd.f32 %v2105_v9, %v2447_v14  ;;  %v891_v19 = vpop.f32.mrb[71].mxu0  ;;  %v1154_v1 = vpop.f32.mrb[71].mxu1 }
 0x1c7   :  { %v1155_v20 = vadd.f32 %v1154_v1, %v2443_v6 }
 0x1c8   :  { %v1955_v21 = vpack.c.bf16 %v1115_v18, %v1112_v11  ;;  %v1985_v13 = vpack.c.bf16 %v1163_v54, %v1160_v50 }
 0x1c9   :  { %v1980_v22 = vpack.c.bf16 %v1155_v20, %v1152_v16 }
 0x1ca   :  { %2003 = vst [vmem:[#allocation8 + $0x88] sm:$0xff] %v1955_v21   ;;  %2009 = vst [vmem:[#allocation8 + $0xb8] sm:$0xff] %v1985_v13  }
 0x1cb   :  { %2008 = vst [vmem:[#allocation8 + $0xb0] sm:$0xff] %v1980_v22  }
 0x1cc   :  { %2321 = shalt.err (!%p2318_p6)
}
 0x1cd   :  { %s2322_s15 = scalar_lea.hbm %s2479_s3, 3072 }
 0x1ce   :  { %p2323_p7 = scmp.ne.s32.totalorder %s2479_s3, %s2322_s15  ;;  %p2326_p8 = scmp.lt.u32.totalorder %s2322_s15, %s2479_s3 }
 0x1d0   :  { %p2328_p9 = pnand %p2326_p8, %p2323_p7 }
 0x1d2   :  { %2331 = shalt.err (!%p2328_p9)
}
 0x1d3   :  { %1668 = dma.vmem_to_hbm [thread:$0]  %s1663_s11, 3072, %s2479_s3, [#allocation5], %s2342_s0, %s2342_s0, %s2343_s8  }
 0x1d4   :  { %2336 = dma.done.wait [#allocation5], 3072  }
 0x1d5   :  { %2337 = vsyncadd [#allocation5], 4294964224 }
 0x1d6   :  { %1672 = vsyncpa [#allocation4], 1 }
 0x1d7   :  { %1673 = vsyncpa [#allocation7], 1 }
 0x1d8   :  { %1674 = vsyncpa [#allocation5], 1 }

</bundles_post_ra>
